<compile_context>
chip_gen: v6e
topology: v6e:2x2x1
jax: 0.10.0
libtpu: 0.0.40
codegen_flags: <defaults>
</compile_context>

<pallas_src>
import functools

import jax
import jax.numpy as jnp
from jax.experimental import pallas as pl
from jax.experimental.pallas import tpu as pltpu


def _tpu_vmem_capacity_bytes(default=64 * 1024 * 1024):
    """Best-effort VMEM capacity query; falls back to a conservative 64 MiB."""
    try:
        info = pltpu.get_tpu_info()
    except Exception:
        return default
    for attr in ("vmem_capacity_bytes", "vmem_bytes", "vmem_size_bytes"):
        cap = getattr(info, attr, None)
        if cap:
            return int(cap)
    return default


def _int_pow(base, gamma):
    """base ** gamma; repeated multiplies for small integer gamma (avoids EUP
    log+exp and is exact near base ~ 0, e.g. easy samples with pt ~ 1)."""
    g = float(gamma)
    if g == int(g) and 0 <= int(g) <= 8:
        n = int(g)
        if n == 0:
            return jnp.ones_like(base)
        out = base
        for _ in range(n - 1):
            out = out * base
        return out
    return base ** jnp.float32(g)


def _focal_kernel(logits_ref, targets_ref, *acc_refs, gamma, ignore_index,
                  reduced_threshold, hw, tile_p, grid_pc, needs_tail_mask,
                  normalized):
    if normalized:
        loss_acc_ref, focal_acc_ref = acc_refs
    else:
        (loss_acc_ref,) = acc_refs

    p = pl.program_id(2)

    @pl.when(p == 0)
    def _():
        loss_acc_ref[...] = jnp.zeros_like(loss_acc_ref)
        if normalized:
            focal_acc_ref[...] = jnp.zeros_like(focal_acc_ref)

    x = logits_ref[0].astype(jnp.float32)            # (C, TP): classes on sublanes
    t = targets_ref[0]                               # (1, TP) int32
    C, TP = x.shape

    # softmax pieces along the class (sublane) axis
    m = jnp.max(x, axis=0, keepdims=True)            # (1, TP)
    ex = jnp.exp(x - m)                              # (C, TP)
    sum_exp = jnp.sum(ex, axis=0, keepdims=True)     # (1, TP)

    # one-hot gather of the target logit (no dynamic per-lane gather on TPU)
    # TODO(synk): targets outside [0, C) that are not ignore_index produce an
    # all-false one-hot (ce becomes logsumexp), matching neither PyTorch nor
    # a real CE; callers must use ignore_index for void labels.
    cls = jax.lax.broadcasted_iota(jnp.int32, (C, TP), 0)
    onehot = cls == t                                # (C, TP)
    x_t = jnp.sum(jnp.where(onehot, x, 0.0), axis=0, keepdims=True)    # (1, TP)

    ce = (jnp.log(sum_exp) + m) - x_t                # (1, TP) = -log_softmax[target]
    pt = jnp.exp(-ce)                                # (1, TP); EUP, matches reference

    if reduced_threshold is None:
        focal = _int_pow(1.0 - pt, gamma)
    else:
        thr = jnp.float32(reduced_threshold)
        focal = _int_pow((1.0 - pt) / thr, gamma)
        focal = jnp.where(pt < thr, jnp.float32(1.0), focal)

    # valid = real pixel (tail of the last tile masked in-kernel, no HBM pad)
    #         and target != ignore_index (loss=0, focal_term=0, like nll_loss).
    valid = t != ignore_index                        # (1, TP)
    if needs_tail_mask:
        # Scalar-unit arithmetic; one vector compare + and per tile.
        p_glob = pl.program_id(1) * grid_pc + p
        limit = hw - p_glob * tile_p
        lane = jax.lax.broadcasted_iota(jnp.int32, (1, TP), 1)
        valid = valid & (lane < limit)

    # Keep true selects (not multiply-by-mask): the OOB tail may hold NaN/inf.
    loss = jnp.where(valid, focal * ce, 0.0)         # (1, TP)

    # Lane-dense per-(batch, chunk) partial accumulators, output-resident
    # across p; the final cross-lane reduction happens once, outside.
    loss_acc_ref[...] = loss_acc_ref[...] + loss[None, None]
    if normalized:
        focal_m = jnp.where(valid, focal, 0.0)       # (1, TP)
        focal_acc_ref[...] = focal_acc_ref[...] + focal_m[None, None]


def softmax_focal_loss_with_logits(inputs, targets, *, gamma=2.0,
                                   reduction="mean", normalized=False,
                                   reduced_threshold=None, ignore_index=-100,
                                   eps=1e-6, tile_bytes=None):
    """inputs: [B,C,H,W] float logits; targets: [B,H,W] int labels."""
    B, C, H, W = inputs.shape
    hw = H * W
    n_total = B * hw

    # Keep NCHW layout: only fold H,W -> HW (contiguous reshape, free).
    # dtype is passed through (bf16 logits stay bf16 on the wire).
    x = inputs.reshape(B, C, hw)
    t = targets.reshape(B, 1, hw).astype(jnp.int32)

    # Generation-aware sizing: bigger tiles + higher scoped-VMEM limit where
    # the part has 128 MiB VMEM (v5e/v6e); moderate on 64 MiB parts (v7x).
    vmem_cap = _tpu_vmem_capacity_bytes()
    if tile_bytes is None:
        tile_bytes = (4 << 20) if vmem_cap >= (96 << 20) else (2 << 20)
    vmem_limit = int(max(32 << 20, min(vmem_cap * 3 // 4, 96 << 20)))

    # tile_p sized against the f32 (sublane-padded) intermediates; multiple of
    # 128 lanes; tail masked in-kernel instead of padding HBM.
    c_pad = ((C + 7) // 8) * 8
    tile_p = max(128, (tile_bytes // (c_pad * 4)) // 128 * 128)
    tile_p = min(tile_p, pl.cdiv(hw, 128) * 128)
    grid_p = pl.cdiv(hw, tile_p)

    # Megacore (v7x): if B alone cannot balance 2 TensorCores, split the pixel
    # tiles into a second parallel axis with its own accumulator slot.
    n_chunks = 2 if (B % 2 == 1 and grid_p >= 2) else 1
    grid_pc = pl.cdiv(grid_p, n_chunks)
    needs_tail_mask = (n_chunks * grid_pc * tile_p) != hw

    if n_chunks * grid_pc == grid_p:
        def pix_block(c, p):
            return c * grid_pc + p
    else:
        # Chunk padding may create fully-OOB tiles; clamp the block index (the
        # in-kernel positional mask zeroes their contribution).
        def pix_block(c, p):
            return jnp.minimum(c * grid_pc + p, grid_p - 1)

    in_specs = [
        pl.BlockSpec((1, C, tile_p), lambda b, c, p: (b, 0, pix_block(c, p))),
        pl.BlockSpec((1, 1, tile_p), lambda b, c, p: (b, 0, pix_block(c, p))),
    ]
    acc_shape = jax.ShapeDtypeStruct((B, n_chunks, 1, tile_p), jnp.float32)
    acc_spec = pl.BlockSpec((1, 1, 1, tile_p), lambda b, c, p: (b, c, 0, 0))

    if normalized:
        out_shape = (acc_shape, acc_shape)
        out_specs = (acc_spec, acc_spec)
    else:
        out_shape = acc_shape
        out_specs = acc_spec

    kernel = functools.partial(
        _focal_kernel, gamma=gamma, ignore_index=ignore_index,
        reduced_threshold=reduced_threshold, hw=hw, tile_p=tile_p,
        grid_pc=grid_pc, needs_tail_mask=needs_tail_mask,
        normalized=normalized)

    out = pl.pallas_call(
        kernel,
        out_shape=out_shape,
        grid_spec=pltpu.PrefetchScalarGridSpec(
            num_scalar_prefetch=0,
            grid=(B, n_chunks, grid_pc),
            in_specs=in_specs,
            out_specs=out_specs,
        ),
        compiler_params=pltpu.CompilerParams(
            dimension_semantics=("parallel", "parallel", "arbitrary"),
            vmem_limit_bytes=vmem_limit),
    )(x, t)

    if normalized:
        loss_part, focal_part = out
        loss_sum = jnp.sum(loss_part)
        loss_sum = loss_sum / jnp.maximum(jnp.sum(focal_part), eps)
    else:
        loss_sum = jnp.sum(out)

    if reduction == "mean":
        # PyTorch reference takes .mean() over ALL spatial elements
        # (ignored positions contribute 0 but are still counted).
        return loss_sum / jnp.float32(n_total)
    if reduction == "sum":
        return loss_sum
    # TODO(synk): reduction='none' / 'batchwise_mean' would need a per-element
    # output tensor; only 'mean' and 'sum' are exposed here.
    raise NotImplementedError(f"reduction={reduction!r} not supported")


class CrossEntropyFocalLoss:
    """JAX/Pallas port of pytorch_toolbelt.losses.CrossEntropyFocalLoss."""

    def __init__(self, gamma=2.0, reduction="mean", normalized=False,
                 reduced_threshold=None, ignore_index=-100):
        self.gamma = gamma
        self.reduction = reduction
        self.normalized = normalized
        self.reduced_threshold = reduced_threshold
        self.ignore_index = ignore_index

    def __call__(self, inputs, targets):
        return softmax_focal_loss_with_logits(
            inputs, targets,
            gamma=self.gamma,
            reduction=self.reduction,
            normalized=self.normalized,
            reduced_threshold=self.reduced_threshold,
            ignore_index=self.ignore_index,
        )


def _reference(inputs, targets, *, gamma=2.0, reduction="mean",
               normalized=False, reduced_threshold=None, ignore_index=-100,
               eps=1e-6):
    """Plain-JAX reference matching pytorch_toolbelt semantics, for checking."""
    B, C, H, W = inputs.shape
    x = jnp.transpose(inputs, (0, 2, 3, 1)).reshape(-1, C).astype(jnp.float32)
    t = targets.reshape(-1)
    logp = jax.nn.log_softmax(x, axis=-1)
    valid = t != ignore_index
    t_safe = jnp.where(valid, t, 0)
    ce = -jnp.take_along_axis(logp, t_safe[:, None].astype(jnp.int32), axis=1)[:, 0]
    ce = jnp.where(valid, ce, 0.0)
    pt = jnp.exp(-ce)
    if reduced_threshold is None:
        focal = (1.0 - pt) ** gamma
    else:
        focal = jnp.where(pt < reduced_threshold, 1.0,
                          ((1.0 - pt) / reduced_threshold) ** gamma)
    loss = focal * ce
    if normalized:
        loss = loss / jnp.maximum(focal.sum(), eps)
    if reduction == "mean":
        return loss.mean()
    if reduction == "sum":
        return loss.sum()
    return loss


if __name__ == "__main__":
    key = jax.random.PRNGKey(0)
    k1, k2, k3, k4, k5 = jax.random.split(key, 5)

    # --- Test 1: default config (gamma=2, mean, not normalized) -------------
    B, C, H, W = 2, 4, 16, 16
    inputs = jax.random.normal(k1, (B, C, H, W), dtype=jnp.float32)
    targets = jax.random.randint(k2, (B, H, W), 0, C, dtype=jnp.int32)
    ignore_mask = jax.random.uniform(k3, (B, H, W)) < 0.1
    targets = jnp.where(ignore_mask, -100, targets)

    loss_fn = CrossEntropyFocalLoss(gamma=2.0, reduction="mean",
                                    normalized=False, reduced_threshold=None,
                                    ignore_index=-100)
    out = jax.block_until_ready(loss_fn(inputs, targets))
    ref = _reference(inputs, targets, gamma=2.0, reduction="mean",
                     normalized=False, reduced_threshold=None,
                     ignore_index=-100)
    assert jnp.allclose(out, ref, rtol=1e-5, atol=1e-6), (out, ref)

    # --- Test 2: normalized path (exercises the second accumulator) ---------
    loss_fn_norm = CrossEntropyFocalLoss(gamma=2.0, reduction="mean",
                                         normalized=True,
                                         reduced_threshold=None,
                                         ignore_index=-100)
    out_n = jax.block_until_ready(loss_fn_norm(inputs, targets))
    ref_n = _reference(inputs, targets, gamma=2.0, reduction="mean",
                       normalized=True, reduced_threshold=None,
                       ignore_index=-100)
    assert jnp.allclose(out_n, ref_n, rtol=1e-5, atol=1e-6), (out_n, ref_n)

    # --- Test 3: non-multiple-of-128 spatial size (tail mask) + odd C -------
    B2, C2, H2, W2 = 1, 3, 15, 15
    inputs2 = jax.random.normal(k4, (B2, C2, H2, W2), dtype=jnp.float32)
    targets2 = jax.random.randint(k5, (B2, H2, W2), 0, C2, dtype=jnp.int32)
    out2 = jax.block_until_ready(
        CrossEntropyFocalLoss()(inputs2, targets2))
    ref2 = _reference(inputs2, targets2)
    assert jnp.allclose(out2, ref2, rtol=1e-5, atol=1e-6), (out2, ref2)

    print("KERNEL_OK")
</pallas_src>

<mosaic_0001>
module attributes {stable_mosaic.version = 11 : i64} {
  func.func @_focal_kernel(%arg0: i32, %arg1: i32, %arg2: i32, %arg3: memref<1x4x256xf32, #tpu.memory_space<vmem>>, %arg4: memref<1x1x256xi32, #tpu.memory_space<vmem>>, %arg5: memref<1x1x1x256xf32, #tpu.memory_space<vmem>>) attributes {dimension_semantics = [#tpu.dimension_semantics<parallel>, #tpu.dimension_semantics<parallel>, #tpu.dimension_semantics<arbitrary>], iteration_bounds = array<i64: 2, 1, 1>, scalar_prefetch = 0 : i64, scratch_operands = 0 : i64, tpu.core_type = #tpu.core_type<tc>, window_params = [{transform_indices = @transform_0, window_bounds = array<i64: 1, 4, 256>}, {transform_indices = @transform_1, window_bounds = array<i64: 1, 1, 256>}, {transform_indices = @transform_2, window_bounds = array<i64: 1, 1, 1, 256>}]} {
    %c0_i32 = arith.constant 0 : i32
    %0 = arith.cmpi eq, %arg2, %c0_i32 : i32
    %1 = arith.extui %0 : i1 to i32
    %c0_i32_0 = arith.constant 0 : i32
    %2 = arith.cmpi ne, %1, %c0_i32_0 : i32
    scf.if %2 {
      %cst_20 = arith.constant 0.000000e+00 : f32
      %39 = vector.broadcast %cst_20 : f32 to vector<1x1x1x256xf32>
      %c0_21 = arith.constant 0 : index
      %c0_22 = arith.constant 0 : index
      %c0_23 = arith.constant 0 : index
      %c0_24 = arith.constant 0 : index
      %40 = vector.load %arg5[%c0_21, %c0_22, %c0_23, %c0_24] : memref<1x1x1x256xf32, #tpu.memory_space<vmem>>, vector<1x1x1x256xf32>
      tpu.vector_store %arg5[%c0_21, %c0_22, %c0_23, %c0_24], %39 {strides = array<i32>} : memref<1x1x1x256xf32, #tpu.memory_space<vmem>>, vector<1x1x1x256xf32>,
    } else {
    }
    %c0 = arith.constant 0 : index
    %c0_1 = arith.constant 0 : index
    %c0_2 = arith.constant 0 : index
    %3 = vector.load %arg3[%c0, %c0_1, %c0_2] : memref<1x4x256xf32, #tpu.memory_space<vmem>>, vector<1x4x256xf32>
    %4 = vector.shape_cast %3 : vector<1x4x256xf32> to vector<4x256xf32>
    %c0_3 = arith.constant 0 : index
    %c0_4 = arith.constant 0 : index
    %c0_5 = arith.constant 0 : index
    %5 = vector.load %arg4[%c0_3, %c0_4, %c0_5] : memref<1x1x256xi32, #tpu.memory_space<vmem>>, vector<1x1x256xi32>
    %6 = vector.shape_cast %5 : vector<1x1x256xi32> to vector<1x256xi32>
    %cst = arith.constant dense<0xFF800000> : vector<256xf32>
    %7 = vector.multi_reduction <maximumf>, %4, %cst [0] : vector<4x256xf32> to vector<256xf32>
    %8 = vector.shape_cast %7 : vector<256xf32> to vector<1x256xf32>
    %9 = vector.broadcast %8 : vector<1x256xf32> to vector<4x256xf32>
    %10 = arith.subf %4, %9 : vector<4x256xf32>
    %11 = math.exp %10 : vector<4x256xf32>
    %cst_6 = arith.constant dense<0.000000e+00> : vector<256xf32>
    %12 = vector.multi_reduction <add>, %11, %cst_6 [0] : vector<4x256xf32> to vector<256xf32>
    %13 = vector.shape_cast %12 : vector<256xf32> to vector<1x256xf32>
    %14 = tpu.iota {dimensions = array<i32: 0>} : vector<4x256xi32>
    %15 = vector.broadcast %6 : vector<1x256xi32> to vector<4x256xi32>
    %16 = arith.cmpi eq, %14, %15 : vector<4x256xi32>
    %cst_7 = arith.constant 0.000000e+00 : f32
    %17 = vector.broadcast %cst_7 : f32 to vector<4x256xf32>
    %18 = arith.select %16, %4, %17 : vector<4x256xi1>, vector<4x256xf32>
    %cst_8 = arith.constant dense<0.000000e+00> : vector<256xf32>
    %19 = vector.multi_reduction <add>, %18, %cst_8 [0] : vector<4x256xf32> to vector<256xf32>
    %20 = vector.shape_cast %19 : vector<256xf32> to vector<1x256xf32>
    %21 = math.log %13 : vector<1x256xf32>
    %22 = arith.addf %21, %8 : vector<1x256xf32>
    %23 = arith.subf %22, %20 : vector<1x256xf32>
    %cst_9 = arith.constant 0.000000e+00 : f32
    %24 = vector.broadcast %cst_9 : f32 to vector<1x256xf32>
    %25 = arith.subf %24, %23 : vector<1x256xf32>
    %26 = math.exp %25 : vector<1x256xf32>
    %cst_10 = arith.constant 1.000000e+00 : f32
    %27 = vector.broadcast %cst_10 : f32 to vector<1x256xf32>
    %28 = arith.subf %27, %26 : vector<1x256xf32>
    %29 = arith.mulf %28, %28 : vector<1x256xf32>
    %c-100_i32 = arith.constant -100 : i32
    %30 = vector.broadcast %c-100_i32 : i32 to vector<1x256xi32>
    %31 = arith.cmpi ne, %6, %30 : vector<1x256xi32>
    %32 = arith.mulf %29, %23 : vector<1x256xf32>
    %cst_11 = arith.constant 0.000000e+00 : f32
    %33 = vector.broadcast %cst_11 : f32 to vector<1x256xf32>
    %34 = arith.select %31, %32, %33 : vector<1x256xi1>, vector<1x256xf32>
    %c0_12 = arith.constant 0 : index
    %c0_13 = arith.constant 0 : index
    %c0_14 = arith.constant 0 : index
    %c0_15 = arith.constant 0 : index
    %35 = vector.load %arg5[%c0_12, %c0_13, %c0_14, %c0_15] : memref<1x1x1x256xf32, #tpu.memory_space<vmem>>, vector<1x1x1x256xf32>
    %36 = vector.shape_cast %34 : vector<1x256xf32> to vector<1x1x1x256xf32>
    %37 = arith.addf %35, %36 : vector<1x1x1x256xf32>
    %c0_16 = arith.constant 0 : index
    %c0_17 = arith.constant 0 : index
    %c0_18 = arith.constant 0 : index
    %c0_19 = arith.constant 0 : index
    %38 = vector.load %arg5[%c0_16, %c0_17, %c0_18, %c0_19] : memref<1x1x1x256xf32, #tpu.memory_space<vmem>>, vector<1x1x1x256xf32>
    tpu.vector_store %arg5[%c0_16, %c0_17, %c0_18, %c0_19], %37 {strides = array<i32>} : memref<1x1x1x256xf32, #tpu.memory_space<vmem>>, vector<1x1x1x256xf32>,
    return
  }
  func.func @transform_0(%arg0: i32, %arg1: i32, %arg2: i32) -> (i32, i32, i32) {
    %c1_i32 = arith.constant 1 : i32
    %0 = arith.muli %arg1, %c1_i32 : i32
    %1 = arith.addi %0, %arg2 : i32
    %c0_i32 = arith.constant 0 : i32
    %c0_i32_0 = arith.constant 0 : i32
    return %arg0, %c0_i32, %1 : i32, i32, i32
  }
  func.func @transform_1(%arg0: i32, %arg1: i32, %arg2: i32) -> (i32, i32, i32) {
    %c1_i32 = arith.constant 1 : i32
    %0 = arith.muli %arg1, %c1_i32 : i32
    %1 = arith.addi %0, %arg2 : i32
    %c0_i32 = arith.constant 0 : i32
    %c0_i32_0 = arith.constant 0 : i32
    return %arg0, %c0_i32, %1 : i32, i32, i32
  }
  func.func @transform_2(%arg0: i32, %arg1: i32, %arg2: i32) -> (i32, i32, i32, i32) {
    %c0_i32 = arith.constant 0 : i32
    %c0_i32_0 = arith.constant 0 : i32
    %c0_i32_1 = arith.constant 0 : i32
    return %arg0, %arg1, %c0_i32, %c0_i32_0 : i32, i32, i32, i32
  }
}

</mosaic_0001>

<bundles_post_ra>
// kernel: tpu_custom_call.1
= control target key start
LH: loop header
LB: loop body
LE: loop exit
PB: predicated region body
PF: predicated region fallthrough
CT: control target
= control target key end

     0   :  { %7 = vsyncpa [#allocation3], 0  ;;  %s960_s0 = inlined_call_operand.hbm [shape: f32[2,4,256], index: 0, kind: input, shape index: {}]   ;;  %s961_s1 = inlined_call_operand.hbm [shape: s32[2,1,256], index: 1, kind: input, shape index: {}]   ;;  %s962_s2 = inlined_call_operand.hbm [shape: f32[2,1,1,256], index: 2, kind: output, shape index: {}]  }
   0x1   :  { %9 = vsyncpa [#allocation3 + $0x1], 0 }
   0x2   :  { %10 = vsyncpa [#allocation6], 0 }
   0x3   :  { %12 = vsyncpa [#allocation6 + $0x1], 0 }
   0x4   :  { %13 = vsyncpa [#allocation4], 0 }
   0x5   :  { %15 = vsyncpa [#allocation4 + $0x1], 0  ;;  %s761_s9 = smov 0   ;;  %s763_s10 = smov 0  }
   0x6   :  { %s765_s11 = smov 0   ;;  %s767_s12 = smov 0  }
   0x7   :  { %s769_s13 = smov 0   ;;  %s771_s14 = smov 0  }
   0x8 LB: > { %s497_s15 = sadd.s32 4294967295, %s739_s14   ;;  %s498_s16 = sadd.s32 4294967294, %s739_s14   ;;  %s739_s14 = sphi %s771_s14, %s21_s14   ;;  %s735_s13 = sphi %s769_s13, %s976_s13   ;;  %s731_s12 = sphi %s767_s12, %s975_s12   ;;  %s727_s11 = sphi %s765_s11, %s974_s11   ;;  %s723_s10 = sphi %s763_s10, %s973_s10   ;;  %s719_s9 = sphi %s761_s9, %s972_s9  }
   0x9   : > { %s40_s17 = sadd.s32 1, %s735_s13  ;;  %s51_s18 = sadd.s32 1, %s727_s11 }
   0xa   : > { %p42_p0 = scmp.ge.s32.totalorder %s40_s17, 2  ;;  %p58_p1 = scmp.ne.s32.totalorder %s727_s11, %s723_s10 }
   0xb   : > { %p59_p2 = scmp.eq.s32.totalorder %s739_s14, 0  ;;  %p64_p3 = scmp.ne.s32.totalorder %s723_s10, %s719_s9 }
   0xc   : > { %s978_s17 = smov (%p42_p0, %s40_s17), 0  ;;  %p65_p5 = scmp.eq.s32.totalorder %s497_s15, 0 }
   0xd   : > { %p802_p4 = por %p59_p2, %p58_p1  ;;  %s46_s20 = ssub.s32 %s735_s13, %s978_s17 }
   0xe   : > { %p120_p6 = scmp.eq.s32.totalorder %s497_s15, 1  ;;  %p49_p7 = scmp.eq.s32.totalorder %s46_s20, 0 }
   0xf   : > { %p808_p8 = por %p65_p5, %p64_p3  ;;  %p126_p10 = scmp.eq.s32.totalorder %s498_s16, 1 }
  0x10   : > { %p812_p9 = por %p120_p6, %p58_p1  ;;  %p536_p13 = scmp.lt.s32.totalorder %s739_s14, 2 }
  0x11   : > { %s817_s23 = scalar_select %p49_p7, %s727_s11, %s51_s18  }
  0x12   : > { %p819_p11 = por %p126_p10, %p64_p3  ;;  %s826_s25 = sand.u32 1, %s727_s11  }
  0x13   : > { %s501_s26 = sshll.u32 %s826_s25, 3  ;;  %s516_s27 = sshll.u32 %s735_s13, 7 }
  0x14   : > { %s159_s30 = scalar_lea.hbm %s960_s0, %s516_s27  ;;  %s150_s3 = scalar_lea.vmem [#allocation2], %s501_s26 }
  0x15   : > { %s161_s4 = sshll.u32 %s150_s3, 4  ;;  %p835_p0 = pnand %p536_p13, %p802_p4  ;;  %s162_s4 = int_to_ptr.vmem [resolvable:$true] %s161_s4 }
  0x16   : > { %p507_p1 = scmp.ge.s32.totalorder %s739_s14, 1  ;;  %p188_p2 = scmp.lt.s32.totalorder %s739_s14, 3 }
  0x17   : > { %s147_s6 = scalar_lea.sflag [#allocation3], %s826_s25  ;;  %p601_p3 = pneg %p835_p0 }
  0x18   : > { %s612_s7 = scalar_lea.vmem %s162_s4, 128  ;;  %s741_s8 = smov [#allocation2]  }
  0x19   : > { %p613_p5 = scmp.ne.s32.totalorder %s162_s4, %s612_s7  ;;  %s617_s15 = sshll.u32 %s741_s8, 4  ;;  %s618_s15 = int_to_ptr.vmem [resolvable:$false] %s617_s15 }
  0x1a   : > { %s619_s16 = scalar_lea.vmem %s618_s15, 256  ;;  %p620_p4 = scmp.lt.s32.totalorder %s162_s4, %s618_s15 }
  0x1b   : > { %p615_p6 = pnand %p613_p5, %p601_p3  ;;  %p621_p10 = scmp.lt.s32.totalorder %s619_s16, %s612_s7 }
  0x1d   : > { %p616_p7 = pneg %p615_p6  ;;  %p622_p13 = por %p621_p10, %p620_p4 }
  0x1f   : > { %p623_p12 = pnand %p622_p13, %p616_p7 }
  0x21   : > { %626 = shalt.err (!%p623_p12)
}
  0x22   : > { %528 = dma.hbm_to_vmem [thread:$0]  (!%p835_p0), %s159_s30, 128, %s162_s4, %s147_s6  }
  0x23   : > { %p853_p5 = pnand %p507_p1, %p188_p2  ;;  %s504_s19 = sshll.u32 %s826_s25, 1 }
  0x24   : > { %s517_s20 = sshll.u32 %s735_s13, 5  ;;  %s172_s29 = scalar_lea.vmem [#allocation5], %s504_s19 }
  0x25   : > { %s181_s28 = scalar_lea.hbm %s961_s1, %s517_s20  ;;  %s183_s3 = sshll.u32 %s172_s29, 4  ;;  %s184_s3 = int_to_ptr.vmem [resolvable:$true] %s183_s3 }
  0x26   : > { %s169_s7 = scalar_lea.sflag [#allocation6], %s826_s25  ;;  %s640_s8 = scalar_lea.vmem %s184_s3, 32 }
  0x27   : > { %p641_p12 = scmp.ne.s32.totalorder %s184_s3, %s640_s8  ;;  %s742_s30 = smov [#allocation5]  }
  0x28   : > { %s645_s4 = sshll.u32 %s742_s30, 4  ;;  %s646_s4 = int_to_ptr.vmem [resolvable:$false] %s645_s4 }
  0x29   : > { %p643_p6 = pnand %p641_p12, %p601_p3  ;;  %s647_s6 = scalar_lea.vmem %s646_s4, 64 }
  0x2a   : > { %p648_p1 = scmp.lt.s32.totalorder %s184_s3, %s646_s4  ;;  %p649_p2 = scmp.lt.s32.totalorder %s647_s6, %s640_s8 }
  0x2b   : > { %p644_p7 = pneg %p643_p6 }
  0x2c   : > { %p650_p4 = por %p649_p2, %p648_p1 }
  0x2e   : > { %p651_p10 = pnand %p650_p4, %p644_p7 }
  0x30   : > { %654 = shalt.err (!%p651_p10)
}
  0x31   : > { %531 = dma.hbm_to_vmem [thread:$0]  (!%p835_p0), %s181_s28, 32, %s184_s3, %s169_s7  }
  0x32   : > { %192 = sbr.rel (%p853_p5) target bundleno = 176 (0xb0), region = 28  ;;  %s871_s25 = sand.u32 (!%p853_p5), 1, %s723_s10  }
  0x33   : > { %s508_s15 = sshll.u32 (!%p853_p5), %s871_s25, 3  ;;  %s195_s16 = scalar_lea.sflag (!%p853_p5), [#allocation3], %s871_s25 }
  0x34   : > { %s198_s19 = scalar_lea.vmem (!%p853_p5), [#allocation2], %s508_s15 }
  0x37   : > { %706 = dma.done.wait (%p808_p8), %s195_s16, 128  }
  0x38   : > { %708 = vsyncadd (%p808_p8), %s195_s16, 4294967168  ;;  %s509_s5 = sshll.u32 %s871_s25, 1  ;;  %s204_s18 = scalar_lea.sflag [#allocation6], %s871_s25 }
  0x39   : > { %s881_s20 = scalar_lea.vmem [#allocation5], %s509_s5 }
  0x3a   : > { %710 = dma.done.wait (%p808_p8), %s204_s18, 32  }
  0x3b   : > { %712 = vsyncadd (%p808_p8), %s204_s18, 4294967264  ;;  %v241_v0 = vlaneseq  ;;  %s891_s26 = scalar_lea.vmem [#allocation7], %s509_s5  ;;  %v743_v2 = vmov 0.0   ;;  %vm251_vm1 = vcmask 1043456   ;;  %v246_v3 = vld [vmem:[%s198_s19] sm:$0xff]  ;;  %s518_s21 = sshll.u32 %s731_s12, 5 }
  0x3c   : > { %v249_v4 = vcombine.high %v246_v3, %v246_v3  ;;  %v252_v5 = vsel %vm251_vm1, %v246_v3, -inf  ;;  %v902_v24 = vld [vmem:[%s881_s20] sm:$0x3]  ;;  %s382_s27 = sshll.u32 %s891_s26, 4  ;;  %s380_s3 = scalar_lea.hbm %s962_s2, %s518_s21  ;;  %s383_s27 = int_to_ptr.vmem [resolvable:$true] %s382_s27 }
  0x3d   : > { %vm887_vm0 = vcmp.lt.s32.totalorder %v241_v0, 256  ;;  %v253_v6 = vrot.slane %v252_v5, 4  ;;  %v898_v22 = vshrl.u32 %v241_v0, 7  ;;  %vm336_vm4 = vcmp.ne.s32.totalorder %v902_v24, 4294967196  ;;  %s366_s7 = scalar_lea.sflag [#allocation4], %s871_s25  ;;  %s655_s8 = scalar_lea.vmem %s383_s27, 32 }
  0x3e   : > { %245 = vst.msk [vmem:[%s891_s26] sm:$0x3] %vm887_vm0, %v743_v2  ;;  %v259_v7 = vsel %vm251_vm1, %v249_v4, -inf  ;;  %p656_p8 = scmp.ne.s32.totalorder %s383_s27, %s655_s8  ;;  %s745_s30 = smov [#allocation7]  }
  0x3f   : > { %v254_v8 = vmax.f32 %v252_v5, %v253_v6  ;;  %v260_v9 = vrot.slane %v259_v7, 4  ;;  %v294_v23 = vsub.s32 0, %v898_v22  ;;  %v298_v25 = vsub.s32 1, %v898_v22  ;;  %s659_s4 = sshll.u32 %s745_s30, 4  ;;  %s660_s4 = int_to_ptr.vmem [resolvable:$false] %s659_s4 }
  0x40   : > { %p657_p0 = pnand %p656_p8, %p812_p9  ;;  %s661_s12 = scalar_lea.vmem %s660_s4, 64 }
  0x41   : > { %v255_v10 = vrot.slane %v254_v8, 2  ;;  %v261_v11 = vmax.f32 %v259_v7, %v260_v9  ;;  %v295_v26 = vrot.slane %v902_v24, %v294_v23  ;;  %v299_v27 = vrot.slane %v902_v24, %v298_v25  ;;  %p662_p13 = scmp.lt.s32.totalorder %s383_s27, %s660_s4  ;;  %p663_p5 = scmp.lt.s32.totalorder %s661_s12, %s655_s8 }
  0x42   : > { %v744_v9 = vmov 1966171168   ;;  %p658_p3 = pneg %p657_p0 }
  0x43   : > { %v256_v12 = vmax.f32 %v254_v8, %v255_v10  ;;  %v262_v13 = vrot.slane %v261_v11, 2  ;;  %vm300_vm2 = vcmp.eq.s32.totalorder %v898_v22, %v295_v26  ;;  %vm301_vm3 = vcmp.eq.s32.totalorder %v898_v22, %v299_v27  ;;  %p664_p12 = por %p663_p5, %p662_p13 }
  0x44   : > { %v302_v32 = vsel %vm300_vm2, %v246_v3, 0.0  ;;  %v303_v36 = vsel %vm301_vm3, %v249_v4, 0.0  ;;  %v343_v10 = vunpack.c.l.s4 %v744_v9 }
  0x45   : > { %v257_v14 = vrot.slane %v256_v12, 1  ;;  %v263_v15 = vmax.f32 %v261_v11, %v262_v13  ;;  %v304_v37 = vsel %vm251_vm1, %v302_v32, 0.0  ;;  %v311_v40 = vsel %vm251_vm1, %v303_v36, 0.0  ;;  %v358_v26 = vld [vmem:[%s891_s26] sm:$0x3]  ;;  %p665_p6 = pnand %p664_p12, %p658_p3 }
  0x46   : > { %v305_v43 = vrot.slane %v304_v37, 4  ;;  %v312_v46 = vrot.slane %v311_v40, 4 }
  0x47   : > { %v258_v16 = vmax.f32 %v256_v12, %v257_v14  ;;  %v264_v17 = vrot.slane %v263_v15, 1 }
  0x48   : > { %v306_v49 = vadd.f32 %v305_v43, %v304_v37  ;;  %v313_v51 = vadd.f32 %v312_v46, %v311_v40 }
  0x49   : > { %v265_v18 = vmax.f32 %v263_v15, %v264_v17 }
  0x4a   : > { %v307_v52 = vrot.slane %v306_v49, 2  ;;  %v314_v53 = vrot.slane %v313_v51, 2 }
  0x4b   : > { %v268_v19 = vcombine.low %v258_v16, %v265_v18 }
  0x4c   : > { %v308_v54 = vadd.f32 %v307_v52, %v306_v49  ;;  %v315_v55 = vadd.f32 %v314_v53, %v313_v51 }
  0x4d   : > { %v270_v20 = vsub.f32 %v246_v3, %v268_v19 }
  0x4e   : > { %v309_v56 = vrot.slane %v308_v54, 1  ;;  %v316_v57 = vrot.slane %v315_v55, 1 }
  0x4f   : > { %v271_v21 = vmul.f32 1.442695, %v270_v20 }
  0x50   : > { %v310_v59 = vadd.f32 %v309_v56, %v308_v54  ;;  %v317_v62 = vadd.f32 %v316_v57, %v315_v55 }
  0x51   : > { %589 = vpow2.f32 %v271_v21 }
  0x5e   : > { %v590_v28 = vpop.eup %589 }
  0x5f   : > { %v274_v29 = vcombine.high %v590_v28, %v590_v28  ;;  %v276_v30 = vsel %vm251_vm1, %v590_v28, 0.0 }
  0x60   : > { %v277_v31 = vrot.slane %v276_v30, 4 }
  0x61   : > { %v283_v33 = vsel %vm251_vm1, %v274_v29, 0.0 }
  0x62   : > { %v278_v34 = vadd.f32 %v277_v31, %v276_v30  ;;  %v284_v35 = vrot.slane %v283_v33, 4 }
  0x64   : > { %v279_v38 = vrot.slane %v278_v34, 2  ;;  %v285_v39 = vadd.f32 %v284_v35, %v283_v33 }
  0x66   : > { %v280_v41 = vadd.f32 %v279_v38, %v278_v34  ;;  %v286_v42 = vrot.slane %v285_v39, 2 }
  0x68   : > { %v281_v44 = vrot.slane %v280_v41, 1  ;;  %v287_v45 = vadd.f32 %v286_v42, %v285_v39 }
  0x6a   : > { %v282_v47 = vadd.f32 %v281_v44, %v280_v41  ;;  %v288_v48 = vrot.slane %v287_v45, 1 }
  0x6c   : > { %v289_v50 = vadd.f32 %v288_v48, %v287_v45  ;;  %591 = vlog2.f32 %v282_v47 }
  0x6e   : > { %593 = vlog2.f32 %v289_v50 }
  0x79   : > { %v592_v58 = vpop.eup %591 }
  0x7a   : > { %v319_v60 = vmul.f32 0.6931472, %v592_v58 }
  0x7b   : > { %v594_v61 = vpop.eup %593 }
  0x7c   : > { %v321_v63 = vmul.f32 0.6931472, %v594_v61  ;;  %v322_v0 = vadd.f32 %v319_v60, %v258_v16  ;;  %v344_v16 = vunpack.c.0.s8 %v343_v10 }
  0x7e   : > { %v323_v2 = vadd.f32 %v321_v63, %v265_v18  ;;  %v324_v3 = vsub.f32 %v322_v0, %v310_v59  ;;  %v347_v20 = vsub.s32 %v344_v16, %v898_v22 }
  0x80   : > { %v325_v4 = vsub.f32 %v323_v2, %v317_v62  ;;  %v326_v5 = vsub.f32 0.0, %v324_v3 }
  0x82   : > { %v327_v6 = vsub.f32 0.0, %v325_v4  ;;  %v328_v7 = vmul.f32 1.442695, %v326_v5 }
  0x84   : > { %595 = vpow2.f32 %v328_v7  ;;  %v330_v8 = vmul.f32 1.442695, %v327_v6 }
  0x86   : > { %597 = vpow2.f32 %v330_v8 }
  0x91   : > { %v596_v11 = vpop.eup %595 }
  0x92   : > { %v332_v12 = vsub.f32 1.0, %v596_v11 }
  0x93   : > { %v598_v13 = vpop.eup %597 }
  0x94   : > { %v333_v14 = vsub.f32 1.0, %v598_v13  ;;  %v334_v15 = vmul.f32 %v332_v12, %v332_v12 }
  0x96   : > { %v335_v17 = vmul.f32 %v333_v14, %v333_v14  ;;  %v337_v18 = vmul.f32 %v334_v15, %v324_v3 }
  0x98   : > { %v338_v19 = vmul.f32 %v335_v17, %v325_v4 }
  0x9a   : > { %v341_v21 = vcombine.low %v337_v18, %v338_v19 }
  0x9c   : > { %v348_v23 = vrot.slane %v341_v21, %v347_v20 }
  0x9e   : > { %v355_v25 = vrot.slane %v348_v23, %v347_v20 }
  0xa0   : > { %v357_v27 = vsel %vm336_vm4, %v355_v25, 0.0 }
  0xa1   : > { %v359_v28 = vadd.f32 %v358_v26, %v357_v27 }
  0xa3   : > { %364 = vst.msk [vmem:[%s891_s26] sm:$0x3] %vm887_vm0, %v359_v28 }
  0xa4   : > { %668 = shalt.err (!%p665_p6)
}
  0xa5   : > { %s669_s6 = scalar_lea.hbm %s380_s3, 32  ;;  %s673_s16 = scalar_lea.hbm %s962_s2, 64 }
  0xa6   : > { %p670_p7 = scmp.ne.s32.totalorder %s380_s3, %s669_s6  ;;  %p674_p4 = scmp.lt.s32.totalorder %s380_s3, %s962_s2 }
  0xa7   : > { %p675_p10 = scmp.lt.s32.totalorder %s673_s16, %s669_s6 }
  0xa8   : > { %p671_p1 = pnand %p670_p7, %p812_p9 }
  0xa9   : > { %p676_p8 = por %p675_p10, %p674_p4 }
  0xaa   : > { %p672_p2 = pneg %p671_p1 }
  0xac   : > { %p677_p0 = pnand %p676_p8, %p672_p2 }
  0xae   : > { %680 = shalt.err (!%p677_p0)
}
  0xaf   : > { %523 = dma.vmem_to_hbm [thread:$0]  (%p812_p9), %s383_s27, 32, %s380_s3, %s366_s7  }
  0xb0 PF: > { %s394_s18 = sand.u32 1, %s719_s9   ;;  %p971_p3 = scmp.ge.s32.totalorder %s739_s14, 2 }
  0xb1   : > { %s395_s20 = scalar_lea.sflag [#allocation4], %s394_s18 }
  0xb2   : > { %p533_p13 = pnand %p971_p3, %p819_p11 }
  0xb4   : > { %p534_p5 = pneg %p533_p13 }
  0xb6   : > { %714 = dma.done.wait (%p534_p5), %s395_s20, 32  }
  0xb7   : > { %716 = vsyncadd (%p534_p5), %s395_s20, 4294967264  ;;  %s21_s14 = sadd.s32 1, %s739_s14   ;;  %s972_s9 = smov %s723_s10 }
  0xb8   : > { %p18_p12 = scmp.ge.s32.totalorder %s21_s14, 4   ;;  %s973_s10 = smov %s727_s11 }
  0xb9   : > { %s974_s11 = smov %s817_s23  ;;  %s975_s12 = smov %s735_s13 }
  0xba   : > { %s976_s13 = smov %s978_s17  ;;  %20 = sbr.rel (!%p18_p12) target bundleno = 8 (0x8), region = 90 }
  0xbf   :  { %400 = vsyncpa [#allocation3], 1 }
  0xc0   :  { %402 = vsyncpa [#allocation3 + $0x1], 1 }
  0xc1   :  { %403 = vsyncpa [#allocation6], 1 }
  0xc2   :  { %405 = vsyncpa [#allocation6 + $0x1], 1 }
  0xc3   :  { %406 = vsyncpa [#allocation4], 1 }
  0xc4   :  { %408 = vsyncpa [#allocation4 + $0x1], 1 }

</bundles_post_ra>
